<compile_context>
chip_gen: v7x
topology: tpu7x:2x2x1
jax: 0.10.0
libtpu: 0.0.40
codegen_flags: <defaults>
</compile_context>

<pallas_src>
import jax
import jax.numpy as jnp
from jax.experimental import pallas as pl
from jax.experimental.pallas import tpu as pltpu


def _relu_kernel(x_ref, o_ref):
    # Elementwise ReLU on the current VMEM tile (VPU max with 0).
    x = x_ref[...]
    o_ref[...] = jnp.maximum(x, jnp.zeros((), dtype=x.dtype))


def _sublane_multiple(dtype) -> int:
    """Minimum row-tile multiple for the packed sublane layout of `dtype`."""
    itemsize = jnp.dtype(dtype).itemsize
    return max(8, 32 // max(itemsize, 1))  # f32->8, bf16->16, int8/fp8->32


def _relu_2d(x2: jax.Array, *, sub: int, target_tile_bytes: int,
             inplace: bool) -> jax.Array:
    """Run the tiled ReLU kernel over a 2-D slab (rows tiled, full columns)."""
    R, C = x2.shape
    itemsize = jnp.dtype(x2.dtype).itemsize

    # Rows per tile so a tile is ~target_tile_bytes.
    max_rows = max(1, target_tile_bytes // max(C * itemsize, 1))
    if R <= max_rows:
        tr = R  # single row-block: full extent is always a legal block dim
    else:
        tr = max(sub, (max_rows // sub) * sub)
        if tr >= R:
            tr = R
    grid_r = pl.cdiv(R, tr)

    tile_bytes = tr * C * itemsize
    # in + out, double-buffered ≈ 4 * tile_bytes; keep within v7x's 64 MiB VMEM
    # and above v5e's 16 MiB default scoped limit.
    vmem_limit = int(min(48 << 20, max(32 << 20, 4 * tile_bytes + (4 << 20))))

    extra = {}
    if inplace:
        extra["input_output_aliases"] = {0: 0}

    return pl.pallas_call(
        _relu_kernel,
        out_shape=jax.ShapeDtypeStruct((R, C), x2.dtype),
        grid_spec=pltpu.PrefetchScalarGridSpec(
            num_scalar_prefetch=0,
            grid=(grid_r,),
            in_specs=[pl.BlockSpec((tr, C), lambda i: (i, 0))],
            out_specs=pl.BlockSpec((tr, C), lambda i: (i, 0)),
        ),
        compiler_params=pltpu.CompilerParams(
            dimension_semantics=("parallel",),
            vmem_limit_bytes=vmem_limit,
        ),
        cost_estimate=pl.CostEstimate(
            flops=R * C,
            transcendentals=0,
            bytes_accessed=2 * R * C * itemsize,
        ),
        **extra,
    )(x2)


def _lane_dense_2d(x_flat: jax.Array, *, sub: int, target_tile_bytes: int,
                   inplace: bool) -> jax.Array:
    """x_flat.size must be a multiple of 128; picks the widest lane-dense view."""
    n = x_flat.size
    g = n // 128
    m = 1
    for d in range(min(g, 4096 // 128), 0, -1):  # largest divisor, L <= 4096
        if g % d == 0:
            m = d
            break
    lanes = 128 * m
    return _relu_2d(x_flat.reshape(n // lanes, lanes),
                    sub=sub, target_tile_bytes=target_tile_bytes,
                    inplace=inplace)


def my_relu(x: jax.Array, *, inplace: bool = False,
            target_tile_bytes: int = 4 << 20) -> jax.Array:
    """ReLU over an arbitrary-shaped array via a tiled, lane-dense Pallas kernel."""
    if x.size == 0:
        return x  # nothing to do for empty arrays

    n = x.size
    itemsize = jnp.dtype(x.dtype).itemsize
    sub = _sublane_multiple(x.dtype)

    # Fast path: lane-dense factorization of the total element count, no pad.
    if n % 128 == 0:
        out = _lane_dense_2d(x.reshape(-1), sub=sub,
                             target_tile_bytes=target_tile_bytes,
                             inplace=inplace)
        return out.reshape(x.shape)

    # Ragged total: keep the natural (rows, last-dim) view with full-width
    # column blocks (legal via the "full array dim" rule), still no pad/crop.
    last = x.shape[-1] if x.ndim >= 1 else 1
    x2 = x.reshape(-1, last) if x.ndim >= 1 else x.reshape(1, 1)
    if x2.shape[1] * itemsize * sub <= 2 * target_tile_bytes:
        out = _relu_2d(x2, sub=sub, target_tile_bytes=target_tile_bytes,
                       inplace=inplace)
        return out.reshape(x.shape)

    # Last resort (huge array whose size is not a multiple of 128 and whose
    # rows are too wide to tile): pad the flat view to 128 lanes, crop after.
    # TODO(synk): replace with a manual masked epilogue DMA if this path gets hot.
    pad = (-n) % 128
    xf = jnp.pad(x.reshape(-1), (0, pad))
    out = _lane_dense_2d(xf, sub=sub, target_tile_bytes=target_tile_bytes,
                         inplace=False)
    return out.reshape(-1)[:n].reshape(x.shape)


if __name__ == "__main__":
    key = jax.random.PRNGKey(0)

    # NCHW input, as a PyTorch conv stack would produce: (batch=2, C=4, H=16, W=16)
    x = jax.random.normal(key, (2, 4, 16, 16), dtype=jnp.float32)
    y = my_relu(x)
    jax.block_until_ready(y)
    ref = jnp.maximum(x, 0.0)
    assert y.shape == x.shape and y.dtype == x.dtype
    assert jnp.array_equal(y, ref)

    # Exercise the lane-dense path with a packed dtype (bf16).
    xb = jax.random.normal(key, (4, 256, 512), dtype=jnp.bfloat16)
    yb = my_relu(xb)
    jax.block_until_ready(yb)
    assert yb.shape == xb.shape and yb.dtype == xb.dtype
    assert jnp.array_equal(yb, jnp.maximum(xb, jnp.bfloat16(0)))

    # Exercise the ragged (non-multiple-of-128) fallback path, no padding.
    xr = jax.random.normal(key, (2, 3, 5, 7), dtype=jnp.float32)
    yr = my_relu(xr)
    jax.block_until_ready(yr)
    assert yr.shape == xr.shape and yr.dtype == xr.dtype
    assert jnp.array_equal(yr, jnp.maximum(xr, 0.0))

    print("KERNEL_OK")
</pallas_src>

<mosaic_0001>
module attributes {stable_mosaic.version = 11 : i64} {
  func.func @_relu_kernel(%arg0: i32, %arg1: memref<1x2048xf32, #tpu.memory_space<vmem>>, %arg2: memref<1x2048xf32, #tpu.memory_space<vmem>>) attributes {dimension_semantics = [#tpu.dimension_semantics<parallel>], iteration_bounds = array<i64: 1>, scalar_prefetch = 0 : i64, scratch_operands = 0 : i64, tpu.core_type = #tpu.core_type<tc>, window_params = [{transform_indices = @transform_0, window_bounds = array<i64: 1, 2048>}, {transform_indices = @transform_1, window_bounds = array<i64: 1, 2048>}]} {
    %c0 = arith.constant 0 : index
    %c0_0 = arith.constant 0 : index
    %0 = vector.load %arg1[%c0, %c0_0] : memref<1x2048xf32, #tpu.memory_space<vmem>>, vector<1x2048xf32>
    %cst = arith.constant 0.000000e+00 : f32
    %1 = vector.broadcast %cst : f32 to vector<1x2048xf32>
    %2 = arith.maximumf %0, %1 : vector<1x2048xf32>
    %c0_1 = arith.constant 0 : index
    %c0_2 = arith.constant 0 : index
    %3 = vector.load %arg2[%c0_1, %c0_2] : memref<1x2048xf32, #tpu.memory_space<vmem>>, vector<1x2048xf32>
    tpu.vector_store %arg2[%c0_1, %c0_2], %2 {strides = array<i32>} : memref<1x2048xf32, #tpu.memory_space<vmem>>, vector<1x2048xf32>,
    return
  }
  func.func @transform_0(%arg0: i32) -> (i32, i32) {
    %c0_i32 = arith.constant 0 : i32
    %c0_i32_0 = arith.constant 0 : i32
    return %arg0, %c0_i32 : i32, i32
  }
  func.func @transform_1(%arg0: i32) -> (i32, i32) {
    %c0_i32 = arith.constant 0 : i32
    %c0_i32_0 = arith.constant 0 : i32
    return %arg0, %c0_i32 : i32, i32
  }
}

</mosaic_0001>

<bundles_post_ra>
// kernel: tpu_custom_call.1
= control target key start
LH: loop header
LB: loop body
LE: loop exit
PB: predicated region body
PF: predicated region fallthrough
CT: control target
= control target key end

     0   :  { %6 = vsyncpa [#allocation3], 0  ;;  %s128_s0 = inlined_call_operand.hbm [shape: f32[1,2048], index: 0, kind: input, shape index: {}]   ;;  %s129_s1 = inlined_call_operand.hbm [shape: f32[1,2048], index: 1, kind: output, shape index: {}]  }
   0x1   :  { %7 = vsyncpa [#allocation4], 0  ;;  %s92_s6 = smov [#allocation2]   ;;  %s44_s10 = scalar_lea.hbm %s128_s0, 256 }
   0x2   :  { %s14_s7 = sshll.u32 %s92_s6, 4  ;;  %p45_p0 = scmp.ne.s32.totalorder %s128_s0, %s44_s10  ;;  %s15_s7 = int_to_ptr.vmem [resolvable:$true] %s14_s7 }
   0x3   :  { %p48_p1 = scmp.lt.u32.totalorder %s44_s10, %s128_s0 }
   0x5   :  { %p50_p2 = pnand %p48_p1, %p45_p0 }
   0x7   :  { %53 = shalt.err (!%p50_p2)
}
   0x8   :  { %s54_s15 = scalar_lea.vmem %s15_s7, 256  ;;  %p59_p4 = scmp.lt.s32.totalorder %s15_s7, %s15_s7 }
   0x9   :  { %p55_p3 = scmp.ne.s32.totalorder %s15_s7, %s54_s15  ;;  %p60_p5 = scmp.lt.s32.totalorder %s54_s15, %s54_s15 }
   0xb   :  { %p61_p6 = por %p60_p5, %p59_p4 }
   0xd   :  { %p62_p7 = pnand %p61_p6, %p55_p3 }
   0xf   :  { %65 = shalt.err (!%p62_p7)
}
  0x10   :  { %17 = dma.hbm_to_vmem [thread:$0]  %s128_s0, 256, %s15_s7, [#allocation3]  }
  0x11   :  { %88 = dma.done.wait [#allocation3], 256  }
  0x12   :  { %89 = vsyncadd [#allocation3], 4294967040  ;;  %s93_s18 = smov [#allocation5]   ;;  %v21_v0 = vld [vmem:[#allocation2] sm:$0xff]  ;;  %v22_v1 = vld [vmem:[#allocation2 + $0x8] sm:$0xff] }
  0x13   :  { %s33_s19 = sshll.u32 %s93_s18, 4  ;;  %v23_v2 = vmax.f32 %v21_v0, 0.0  ;;  %v24_v3 = vmax.f32 %v22_v1, 0.0  ;;  %s34_s19 = int_to_ptr.vmem [resolvable:$true] %s33_s19 }
  0x14   :  { %s66_s20 = scalar_lea.vmem %s34_s19, 256  ;;  %p71_p9 = scmp.lt.s32.totalorder %s34_s19, %s34_s19 }
  0x15   :  { %25 = vst [vmem:[#allocation5] sm:$0xff] %v23_v2  ;;  %26 = vst [vmem:[#allocation5 + $0x8] sm:$0xff] %v24_v3  ;;  %p67_p8 = scmp.ne.s32.totalorder %s34_s19, %s66_s20  ;;  %p72_p10 = scmp.lt.s32.totalorder %s66_s20, %s66_s20 }
  0x17   :  { %p73_p11 = por %p72_p10, %p71_p9 }
  0x19   :  { %p74_p12 = pnand %p73_p11, %p67_p8 }
  0x1b   :  { %77 = shalt.err (!%p74_p12)
}
  0x1c   :  { %s78_s22 = scalar_lea.hbm %s129_s1, 256 }
  0x1d   :  { %p79_p13 = scmp.ne.s32.totalorder %s129_s1, %s78_s22  ;;  %p82_p0 = scmp.lt.u32.totalorder %s78_s22, %s129_s1 }
  0x1f   :  { %p84_p1 = pnand %p82_p0, %p79_p13 }
  0x21   :  { %87 = shalt.err (!%p84_p1)
}
  0x22   :  { %36 = dma.vmem_to_hbm [thread:$0]  %s34_s19, 256, %s129_s1, [#allocation4]  }
  0x23   :  { %90 = dma.done.wait [#allocation4], 256  }
  0x24   :  { %91 = vsyncadd [#allocation4], 4294967040 }
  0x25   :  { %40 = vsyncpa [#allocation3], 1 }
  0x26   :  { %41 = vsyncpa [#allocation4], 1 }

</bundles_post_ra>
